<compile_context>
chip_gen: v6e
topology: v6e:2x2x1
jax: 0.10.0
libtpu: 0.0.40
codegen_flags: <defaults>
</compile_context>

<pallas_src>
import jax
import jax.numpy as jnp
from jax import lax
from jax.experimental import pallas as pl
from jax.experimental.pallas import tpu as pltpu

N_NODES = 16
N_EDGES = 8
FEATURE_DIM = 3   # self.feature_dim
HIDDEN_DIM = 10   # self.hidden_dim
MID_DIM = 10      # self.mid_dim

NODE_TYPE_IN_DIMS = {"user": 5, "item": 7}
NODE_TYPE_COUNTS = {"user": 6, "item": 10}

_IN_U = NODE_TYPE_IN_DIMS["user"]
_IN_I = NODE_TYPE_IN_DIMS["item"]
_N_U = NODE_TYPE_COUNTS["user"]
_N_I = NODE_TYPE_COUNTS["item"]
_IN_PACKED = _IN_U + _IN_I                 # 12


# ---------------------------------------------------------------------------
# Fused Pallas kernel: everything in one invocation, all operands in VMEM.
#   x_ref    [N, 3]   node features for conv1
#   h_ref    [N, E]   dense incidence matrix (unit hyperedge weights)
#   conv_ref [15,10]  packed [w1; w2; b1; b2]
#   xp_ref   [N, 12]  block-diagonal packed per-type features (user|item)
#   proj_ref [28, 3]  packed [Wu; Wi; bu tiled x6; bi tiled x10]
# Outputs:
#   out_ref  [N, 10]  conv2 output after ReLU
#   hid_ref  [N, 3]   merged per-type projections (rows 0:6 user, 6:16 item)
# ---------------------------------------------------------------------------
def _hhgnn_fused_kernel(x_ref, h_ref, conv_ref, xp_ref, proj_ref,
                        out_ref, hid_ref):
    h = h_ref[...]                                        # [N, E]

    # --- degree terms, computed ONCE for both conv layers -------------------
    deg_n = jnp.sum(h, axis=1, keepdims=True)             # node degrees D  [N,1]
    deg_e = jnp.sum(h, axis=0, keepdims=True)             # edge degrees B  [1,E]
    # Exact reciprocals (24 elements; neither VPU nor EUP is anywhere near
    # saturated, and approx error would compound through both conv layers).
    d_inv = jnp.where(deg_n > 0.0, 1.0 / deg_n, 0.0)
    b_inv = jnp.where(deg_e > 0.0, 1.0 / deg_e, 0.0)

    # Propagation matrix P = D^{-1} H B^{-1} H^T  ->  [N, N], reused by both layers.
    hw = h * d_inv * b_inv                                # scale rows & cols of H
    p = lax.dot_general(                                  # hw @ h.T
        hw, h, (((1,), (1,)), ((), ())), preferred_element_type=jnp.float32
    )

    # --- unpack the conv parameter slab (static sublane slices) -------------
    w1 = conv_ref[0:FEATURE_DIM, :]                                   # [3, 10]
    w2 = conv_ref[FEATURE_DIM:FEATURE_DIM + HIDDEN_DIM, :]            # [10,10]
    b1 = conv_ref[FEATURE_DIM + HIDDEN_DIM:FEATURE_DIM + HIDDEN_DIM + 1, :]
    b2 = conv_ref[FEATURE_DIM + HIDDEN_DIM + 1:FEATURE_DIM + HIDDEN_DIM + 2, :]

    # --- conv1 + ReLU --------------------------------------------------------
    xw1 = jnp.dot(x_ref[...], w1, preferred_element_type=jnp.float32)
    x1 = jnp.maximum(
        jnp.dot(p, xw1, preferred_element_type=jnp.float32) + b1, 0.0
    )

    # --- conv2 + ReLU --------------------------------------------------------
    xw2 = jnp.dot(x1, w2, preferred_element_type=jnp.float32)
    out_ref[...] = jnp.maximum(
        jnp.dot(p, xw2, preferred_element_type=jnp.float32) + b2, 0.0
    )

    # --- fused per-node-type projections (single matmul + single bias add) ---
    w_proj = proj_ref[0:_IN_PACKED, :]                    # block-diag weight [12,3]
    b_rows = proj_ref[_IN_PACKED:_IN_PACKED + N_NODES, :] # per-row bias     [16,3]
    hid_ref[...] = (
        jnp.dot(xp_ref[...], w_proj, preferred_element_type=jnp.float32) + b_rows
    )


def hhgnn_forward(params, x, h_incidence, x_dict):
    """Single fused pallas_call for the whole forward pass (5 inputs, 2 outputs)."""
    n = x.shape[0]
    vmem_spec = pl.BlockSpec(memory_space=pltpu.MemorySpace.VMEM)

    # Stage the per-type features into one block-diagonal [16, 12] slab so the
    # two projection matmuls fuse into one (user rows use cols 0:5, item rows
    # use cols 5:12).
    xp = jnp.concatenate(
        [
            jnp.pad(x_dict["user"], ((0, 0), (0, _IN_I))),   # [6, 12]
            jnp.pad(x_dict["item"], ((0, 0), (_IN_U, 0))),   # [10,12]
        ],
        axis=0,
    )                                                         # [16,12]

    inputs = (
        x,                         # [16, 3]
        h_incidence,               # [16, 8]
        params["conv_packed"],     # [15,10]
        xp,                        # [16,12]
        params["proj_packed"],     # [28, 3]
    )

    out_shapes = (
        jax.ShapeDtypeStruct((n, MID_DIM), jnp.float32),
        jax.ShapeDtypeStruct((n, FEATURE_DIM), jnp.float32),
    )

    # Advisory cost hint: this call is tiny; don't let XLA serialize around it.
    flops = 2 * (
        N_NODES * N_NODES * N_EDGES            # P = hw @ h^T
        + N_NODES * FEATURE_DIM * HIDDEN_DIM   # x @ w1
        + N_NODES * N_NODES * HIDDEN_DIM       # P @ xw1
        + N_NODES * HIDDEN_DIM * MID_DIM       # x1 @ w2
        + N_NODES * N_NODES * MID_DIM          # P @ xw2
        + N_NODES * _IN_PACKED * FEATURE_DIM   # packed projection
    )
    bytes_accessed = 4 * (
        sum(int(a.size) for a in inputs) + n * MID_DIM + n * FEATURE_DIM
    )
    cost = pl.CostEstimate(
        flops=flops, transcendentals=0, bytes_accessed=bytes_accessed
    )

    out, hid_packed = pl.pallas_call(
        _hhgnn_fused_kernel,
        in_specs=[vmem_spec] * len(inputs),
        out_specs=(vmem_spec, vmem_spec),
        out_shape=out_shapes,
        cost_estimate=cost,
    )(*inputs)

    hid_dim = {
        "user": hid_packed[:_N_U, :],
        "item": hid_packed[_N_U:_N_U + _N_I, :],
    }
    return out, hid_dim


# ---------------------------------------------------------------------------
# Deterministic parameter init (raw params kept for the reference; packed
# slabs built ONCE here so the per-call wrapper does no parameter work).
# ---------------------------------------------------------------------------
def init_params(key):
    keys = jax.random.split(key, 8)
    params = {"proj": {}}
    for idx, (t, in_dim) in enumerate(sorted(NODE_TYPE_IN_DIMS.items())):
        kw, kb = jax.random.split(keys[idx])
        params["proj"][t] = {
            "w": jax.random.normal(kw, (in_dim, FEATURE_DIM), jnp.float32) * 0.1,
            "b": jax.random.normal(kb, (1, FEATURE_DIM), jnp.float32) * 0.1,
        }
    params["conv1"] = {
        "w": jax.random.normal(keys[4], (FEATURE_DIM, HIDDEN_DIM), jnp.float32) * 0.1,
        "b": jax.random.normal(keys[5], (1, HIDDEN_DIM), jnp.float32) * 0.1,
    }
    params["conv2"] = {
        "w": jax.random.normal(keys[6], (HIDDEN_DIM, MID_DIM), jnp.float32) * 0.1,
        "b": jax.random.normal(keys[7], (1, MID_DIM), jnp.float32) * 0.1,
    }

    # --- pre-packed slabs for the kernel (done once at init) ----------------
    params["conv_packed"] = jnp.concatenate(
        [
            params["conv1"]["w"],   # [3, 10]
            params["conv2"]["w"],   # [10,10]
            params["conv1"]["b"],   # [1, 10]
            params["conv2"]["b"],   # [1, 10]
        ],
        axis=0,
    )                               # [15,10]
    params["proj_packed"] = jnp.concatenate(
        [
            params["proj"]["user"]["w"],                        # [5, 3]
            params["proj"]["item"]["w"],                        # [7, 3]
            jnp.tile(params["proj"]["user"]["b"], (_N_U, 1)),   # [6, 3]
            jnp.tile(params["proj"]["item"]["b"], (_N_I, 1)),   # [10,3]
        ],
        axis=0,
    )                               # [28, 3]
    return params


# ---------------------------------------------------------------------------
# Pure-JAX reference (exact reciprocals) for correctness check
# ---------------------------------------------------------------------------
def _ref_hconv(x, h, w, b, relu):
    xw = x @ w
    deg_n = h.sum(1, keepdims=True)
    deg_e = h.sum(0, keepdims=True)
    d_inv = jnp.where(deg_n > 0, 1.0 / deg_n, 0.0)
    b_inv = jnp.where(deg_e > 0, 1.0 / deg_e, 0.0)
    edge_feat = (h.T @ xw) * b_inv.T
    out = (h @ edge_feat) * d_inv + b
    return jnp.maximum(out, 0.0) if relu else out


def _ref_forward(params, x, h, x_dict):
    hid = {t: x_dict[t] @ params["proj"][t]["w"] + params["proj"][t]["b"] for t in x_dict}
    o = _ref_hconv(x, h, params["conv1"]["w"], params["conv1"]["b"], True)
    o = _ref_hconv(o, h, params["conv2"]["w"], params["conv2"]["b"], True)
    return o, hid


if __name__ == "__main__":
    key = jax.random.PRNGKey(0)
    k_param, k_x, k_h, k_u, k_i = jax.random.split(key, 5)

    params = init_params(k_param)

    # node features fed to conv1: [N_NODES, FEATURE_DIM]
    x = jax.random.normal(k_x, (N_NODES, FEATURE_DIM), jnp.float32)
    # dense hyperedge incidence [N_NODES, N_EDGES] (== COO hyperedge_index, unit weights)
    h_incidence = jax.random.bernoulli(k_h, 0.4, (N_NODES, N_EDGES)).astype(jnp.float32)
    # per-type raw features for the projection branch
    x_dict = {
        "user": jax.random.normal(k_u, (_N_U, _IN_U), jnp.float32),
        "item": jax.random.normal(k_i, (_N_I, _IN_I), jnp.float32),
    }

    out, hid_dim = hhgnn_forward(params, x, h_incidence, x_dict)
    out = jax.block_until_ready(out)
    hid_dim = {t: jax.block_until_ready(v) for t, v in hid_dim.items()}

    ref_out, ref_hid = _ref_forward(params, x, h_incidence, x_dict)
    assert out.shape == (N_NODES, MID_DIM)
    # Exact reciprocals now -> tight f32 tolerance everywhere.
    assert jnp.allclose(out, ref_out, atol=1e-5, rtol=1e-5)
    for t in x_dict:
        assert jnp.allclose(hid_dim[t], ref_hid[t], atol=1e-5, rtol=1e-5)

    print("KERNEL_OK")
</pallas_src>

<mosaic_0001>
module attributes {stable_mosaic.version = 11 : i64} {
  func.func @_hhgnn_fused_kernel(%arg0: memref<16x3xf32, #tpu.memory_space<vmem>>, %arg1: memref<16x8xf32, #tpu.memory_space<vmem>>, %arg2: memref<15x10xf32, #tpu.memory_space<vmem>>, %arg3: memref<16x12xf32, #tpu.memory_space<vmem>>, %arg4: memref<28x3xf32, #tpu.memory_space<vmem>>, %arg5: memref<16x10xf32, #tpu.memory_space<vmem>>, %arg6: memref<16x3xf32, #tpu.memory_space<vmem>>) attributes {dimension_semantics = [], scalar_prefetch = 0 : i64, scratch_operands = 0 : i64, tpu.core_type = #tpu.core_type<tc>} {
    %c0 = arith.constant 0 : index
    %c0_0 = arith.constant 0 : index
    %0 = vector.load %arg1[%c0, %c0_0] : memref<16x8xf32, #tpu.memory_space<vmem>>, vector<16x8xf32>
    %cst = arith.constant dense<0.000000e+00> : vector<16xf32>
    %1 = vector.multi_reduction <add>, %0, %cst [1] : vector<16x8xf32> to vector<16xf32>
    %2 = vector.shape_cast %1 : vector<16xf32> to vector<16x1xf32>
    %cst_1 = arith.constant dense<0.000000e+00> : vector<8xf32>
    %3 = vector.multi_reduction <add>, %0, %cst_1 [0] : vector<16x8xf32> to vector<8xf32>
    %4 = vector.shape_cast %3 : vector<8xf32> to vector<1x8xf32>
    %cst_2 = arith.constant 0.000000e+00 : f32
    %5 = vector.broadcast %cst_2 : f32 to vector<16x1xf32>
    %6 = arith.cmpf ogt, %2, %5 : vector<16x1xf32>
    %cst_3 = arith.constant 1.000000e+00 : f32
    %7 = vector.broadcast %cst_3 : f32 to vector<16x1xf32>
    %8 = arith.divf %7, %2 : vector<16x1xf32>
    %cst_4 = arith.constant 0.000000e+00 : f32
    %9 = vector.broadcast %cst_4 : f32 to vector<16x1xf32>
    %10 = arith.select %6, %8, %9 : vector<16x1xi1>, vector<16x1xf32>
    %cst_5 = arith.constant 0.000000e+00 : f32
    %11 = vector.broadcast %cst_5 : f32 to vector<1x8xf32>
    %12 = arith.cmpf ogt, %4, %11 : vector<1x8xf32>
    %cst_6 = arith.constant 1.000000e+00 : f32
    %13 = vector.broadcast %cst_6 : f32 to vector<1x8xf32>
    %14 = arith.divf %13, %4 : vector<1x8xf32>
    %cst_7 = arith.constant 0.000000e+00 : f32
    %15 = vector.broadcast %cst_7 : f32 to vector<1x8xf32>
    %16 = arith.select %12, %14, %15 : vector<1x8xi1>, vector<1x8xf32>
    %17 = vector.broadcast %10 : vector<16x1xf32> to vector<16x8xf32>
    %18 = arith.mulf %0, %17 : vector<16x8xf32>
    %19 = vector.broadcast %16 : vector<1x8xf32> to vector<16x8xf32>
    %20 = arith.mulf %18, %19 : vector<16x8xf32>
    %cst_8 = arith.constant dense<0.000000e+00> : vector<16x16xf32>
    %21 = tpu.matmul %20, %0, %cst_8 {dimension_numbers = #tpu.dot_dimension_numbers<[1], [1], [0], [0], [0, 0, 1, 0], [], []>} : vector<16x8xf32>, vector<16x8xf32>, vector<16x16xf32> -> vector<16x16xf32>
    %c0_9 = arith.constant 0 : index
    %c0_10 = arith.constant 0 : index
    %22 = vector.load %arg2[%c0_9, %c0_10] : memref<15x10xf32, #tpu.memory_space<vmem>>, vector<3x10xf32>
    %c3 = arith.constant 3 : index
    %c0_11 = arith.constant 0 : index
    %23 = vector.load %arg2[%c3, %c0_11] : memref<15x10xf32, #tpu.memory_space<vmem>>, vector<10x10xf32>
    %c13 = arith.constant 13 : index
    %c0_12 = arith.constant 0 : index
    %24 = vector.load %arg2[%c13, %c0_12] : memref<15x10xf32, #tpu.memory_space<vmem>>, vector<1x10xf32>
    %c14 = arith.constant 14 : index
    %c0_13 = arith.constant 0 : index
    %25 = vector.load %arg2[%c14, %c0_13] : memref<15x10xf32, #tpu.memory_space<vmem>>, vector<1x10xf32>
    %c0_14 = arith.constant 0 : index
    %c0_15 = arith.constant 0 : index
    %26 = vector.load %arg0[%c0_14, %c0_15] : memref<16x3xf32, #tpu.memory_space<vmem>>, vector<16x3xf32>
    %cst_16 = arith.constant dense<0.000000e+00> : vector<16x10xf32>
    %27 = tpu.matmul %26, %22, %cst_16 {dimension_numbers = #tpu.dot_dimension_numbers<[1], [0], [0], [1], [0, 0, 1, 1], [], []>} : vector<16x3xf32>, vector<3x10xf32>, vector<16x10xf32> -> vector<16x10xf32>
    %cst_17 = arith.constant dense<0.000000e+00> : vector<16x10xf32>
    %28 = tpu.matmul %21, %27, %cst_17 {dimension_numbers = #tpu.dot_dimension_numbers<[1], [0], [0], [1], [0, 0, 1, 1], [], []>} : vector<16x16xf32>, vector<16x10xf32>, vector<16x10xf32> -> vector<16x10xf32>
    %29 = vector.broadcast %24 : vector<1x10xf32> to vector<16x10xf32>
    %30 = arith.addf %28, %29 : vector<16x10xf32>
    %cst_18 = arith.constant 0.000000e+00 : f32
    %31 = vector.broadcast %cst_18 : f32 to vector<16x10xf32>
    %32 = arith.maximumf %30, %31 : vector<16x10xf32>
    %cst_19 = arith.constant dense<0.000000e+00> : vector<16x10xf32>
    %33 = tpu.matmul %32, %23, %cst_19 {dimension_numbers = #tpu.dot_dimension_numbers<[1], [0], [0], [1], [0, 0, 1, 1], [], []>} : vector<16x10xf32>, vector<10x10xf32>, vector<16x10xf32> -> vector<16x10xf32>
    %cst_20 = arith.constant dense<0.000000e+00> : vector<16x10xf32>
    %34 = tpu.matmul %21, %33, %cst_20 {dimension_numbers = #tpu.dot_dimension_numbers<[1], [0], [0], [1], [0, 0, 1, 1], [], []>} : vector<16x16xf32>, vector<16x10xf32>, vector<16x10xf32> -> vector<16x10xf32>
    %35 = vector.broadcast %25 : vector<1x10xf32> to vector<16x10xf32>
    %36 = arith.addf %34, %35 : vector<16x10xf32>
    %cst_21 = arith.constant 0.000000e+00 : f32
    %37 = vector.broadcast %cst_21 : f32 to vector<16x10xf32>
    %38 = arith.maximumf %36, %37 : vector<16x10xf32>
    %c0_22 = arith.constant 0 : index
    %c0_23 = arith.constant 0 : index
    %39 = vector.load %arg5[%c0_22, %c0_23] : memref<16x10xf32, #tpu.memory_space<vmem>>, vector<16x10xf32>
    tpu.vector_store %arg5[%c0_22, %c0_23], %38 {strides = array<i32>} : memref<16x10xf32, #tpu.memory_space<vmem>>, vector<16x10xf32>,
    %c0_24 = arith.constant 0 : index
    %c0_25 = arith.constant 0 : index
    %40 = vector.load %arg4[%c0_24, %c0_25] : memref<28x3xf32, #tpu.memory_space<vmem>>, vector<12x3xf32>
    %c12 = arith.constant 12 : index
    %c0_26 = arith.constant 0 : index
    %41 = vector.load %arg4[%c12, %c0_26] : memref<28x3xf32, #tpu.memory_space<vmem>>, vector<16x3xf32>
    %c0_27 = arith.constant 0 : index
    %c0_28 = arith.constant 0 : index
    %42 = vector.load %arg3[%c0_27, %c0_28] : memref<16x12xf32, #tpu.memory_space<vmem>>, vector<16x12xf32>
    %cst_29 = arith.constant dense<0.000000e+00> : vector<16x3xf32>
    %43 = tpu.matmul %42, %40, %cst_29 {dimension_numbers = #tpu.dot_dimension_numbers<[1], [0], [0], [1], [0, 0, 1, 1], [], []>} : vector<16x12xf32>, vector<12x3xf32>, vector<16x3xf32> -> vector<16x3xf32>
    %44 = arith.addf %43, %41 : vector<16x3xf32>
    %c0_30 = arith.constant 0 : index
    %c0_31 = arith.constant 0 : index
    %45 = vector.load %arg6[%c0_30, %c0_31] : memref<16x3xf32, #tpu.memory_space<vmem>>, vector<16x3xf32>
    tpu.vector_store %arg6[%c0_30, %c0_31], %44 {strides = array<i32>} : memref<16x3xf32, #tpu.memory_space<vmem>>, vector<16x3xf32>,
    return
  }
}

</mosaic_0001>

<bundles_post_ra>
// kernel: tpu_custom_call.1
= control target key start
LH: loop header
LB: loop body
LE: loop exit
PB: predicated region body
PF: predicated region fallthrough
CT: control target
= control target key end

     0   :  { %vm25_vm0 = vcmask 64512   ;;  %s831_s0 = inlined_call_operand.vmem [shape: f32[16,3], index: 0, kind: input, shape index: {}]   ;;  %s832_s1 = inlined_call_operand.vmem [shape: f32[16,8], index: 1, kind: input, shape index: {}]   ;;  %s833_s2 = inlined_call_operand.vmem [shape: f32[15,10], index: 2, kind: input, shape index: {}]   ;;  %s834_s3 = inlined_call_operand.vmem [shape: f32[16,12], index: 3, kind: input, shape index: {}]   ;;  %s835_s4 = inlined_call_operand.vmem [shape: f32[28,3], index: 4, kind: input, shape index: {}]   ;;  %s836_s5 = inlined_call_operand.hbm [shape: f32[16,10], index: 5, kind: output, shape index: {0}]   ;;  %s837_s6 = inlined_call_operand.vmem [shape: f32[16,3], index: 6, kind: output, shape index: {1}]  }
   0x1   :  { %v23_v0 = vld [vmem:[%s832_s1] sm:$0xff]  ;;  %v24_v1 = vld [vmem:[%s832_s1 + $0x8] sm:$0xff] }
   0x2   :  { %12 = vsyncpa [#allocation3], 0  ;;  %v26_v2 = vsel %vm25_vm0, %v23_v0, 0.0  ;;  %v29_v3 = vsel %vm25_vm0, %v24_v1, 0.0  ;;  %648 = vmatprep.subr.msk.mxu0 %vm25_vm0, %v24_v1  ;;  %v142_v5 = vld [vmem:[%s833_s2] sm:$0x7] }
   0x3   :  { %27 = vadd.xlane.f32.xlu0 %v26_v2  ;;  %v32_v4 = vadd.f32 %v29_v3, %v26_v2  ;;  %649 = vmatpush3.xpose.msk.msra.mxu0 %vm25_vm0, %v24_v1  ;;  %vm156_vm1 = vcmask 1042432   ;;  %v147_v6 = vld [vmem:[%s831_s0] sm:$0xff]  ;;  %vm149_vm2 = vcmask 23552   ;;  %v148_v7 = vld [vmem:[%s831_s0 + $0x8] sm:$0xff]  ;;  %vm239_vm6 = vcmask 130048   ;;  %v495_v46 = vld [vmem:[%s835_s4 + $0x14] sm:$0xff] }
   0x4   :  { %650 = vmatprep.subr.msk.mxu0 %vm25_vm0, %v23_v0  ;;  %655 = vmatprep.subr.msk.mxu1 %vm156_vm1, %v142_v5  ;;  %v144_v30 = vld [vmem:[%s833_s2 + $0xb] sm:$0x3]  ;;  %vm330_vm7 = vcmask 1041408   ;;  %v143_v31 = vld [vmem:[%s833_s2 + $0x3] sm:$0xff]  ;;  %v613_v32 = vld [vmem:[%s833_s2 + $0xd] ss:$0 sm:$0xff] }
   0x5   :  { %656 = vmatpush3.msk.msra.mxu1 %vm156_vm1, %v142_v5  ;;  %657 = vmatprep.mubr.msk.f32.mxu1 %vm149_vm2, %v147_v6  ;;  %v33_v8 = vrot.slane %v32_v4, 4  ;;  %vm323_vm8 = vcmask 80896   ;;  %v493_v39 = vld [vmem:[%s835_s4 + $0x8] sm:$0xf]  ;;  %vm505_vm9 = vcmask 1043456   ;;  %v492_v40 = vld [vmem:[%s835_s4] sm:$0xff] }
   0x6   :  { %658 = vmatmul.mubr.msk.f32.vlgmr.msra.gmra.mxu1 %vm149_vm2, %v148_v7  ;;  %v496_v41 = vld [vmem:[%s834_s3] sm:$0xff]  ;;  %vm498_vm10 = vcmask 97280   ;;  %v497_v42 = vld [vmem:[%s834_s3 + $0x8] sm:$0xff]  ;;  %s719_s27 = smov [#allocation2]  }
   0x7   :  { %30 = vadd.xlane.f32.xlu0 %v29_v3  ;;  %651 = vmatpush3.xpose.msk.msra.mxu0 %vm25_vm0, %v23_v0  ;;  %v34_v9 = vadd.f32 %v33_v8, %v32_v4  ;;  %v494_v48 = vld [vmem:[%s835_s4 + $0xc] sm:$0xff]  ;;  %s591_s4 = sshll.u32 %s719_s27, 4  ;;  %s592_s4 = int_to_ptr.vmem [resolvable:$true] %s591_s4 }
   0x8   :  { %v619_v51 = vld [vmem:[%s833_s2 + $0xe] ss:$0 sm:$0xff]  ;;  %s697_s28 = scalar_lea.vmem %s592_s4, 256  ;;  %p702_p1 = scmp.lt.s32.totalorder %s592_s4, %s592_s4 }
   0x9   :  { %v35_v10 = vrot.slane %v34_v9, 2  ;;  %p698_p0 = scmp.ne.s32.totalorder %s592_s4, %s697_s28  ;;  %p703_p2 = scmp.lt.s32.totalorder %s697_s28, %s697_s28 }
   0xb   :  { %v36_v11 = vadd.f32 %v35_v10, %v34_v9  ;;  %p704_p3 = por %p703_p2, %p702_p1 }
   0xd   :  { %v37_v12 = vrot.slane %v36_v11, 1  ;;  %p705_p4 = pnand %p704_p3, %p698_p0 }
   0xf   :  { %v38_v13 = vadd.f32 %v37_v12, %v36_v11 }
  0x11   :  { %691 = vrcp.f32 %v38_v13  ;;  %vm47_vm3 = vcmp.gt.f32.partialorder %v38_v13, 0.0 }
  0x1e   :  { %v692_v16 = vpop.eup %691 }
  0x1f   :  { %v50_v19 = vsel %vm47_vm3, %v692_v16, 0.0 }
  0x8c   :  { %v28_v14 = vpop.xlane.xlu0 %27 }
  0x8d   :  { %693 = vrcp.f32 %v28_v14  ;;  %vm39_vm4 = vcmp.gt.f32.partialorder %v28_v14, 0.0 }
  0x90   :  { %v31_v15 = vpop.xlane.xlu0 %30 }
  0x91   :  { %695 = vrcp.f32 %v31_v15  ;;  %vm40_vm5 = vcmp.gt.f32.partialorder %v31_v15, 0.0 }
  0x9a   :  { %v694_v17 = vpop.eup %693 }
  0x9b   :  { %v45_v18 = vsel %vm39_vm4, %v694_v17, 0.0 }
  0x9c   :  { %v51_v20 = vmul.f32 %v45_v18, %v23_v0 }
  0x9e   :  { %v696_v21 = vpop.eup %695  ;;  %v53_v22 = vmul.f32 %v51_v20, %v50_v19 }
  0x9f   :  { %v46_v23 = vsel %vm40_vm5, %v696_v21, 0.0 }
  0xa0   :  { %v52_v24 = vmul.f32 %v46_v23, %v24_v1  ;;  %652 = vmatprep.mubr.msk.f32.mxu0 %vm25_vm0, %v53_v22 }
  0xa2   :  { %v54_v25 = vmul.f32 %v52_v24, %v50_v19 }
  0xa4   :  { %653 = vmatmul.mubr.msk.f32.vlgmr.msra.gmra.mxu0 %vm25_vm0, %v54_v25 }
  0xc6   :  { %v659_v26 = vpop.f32.mrf.mxu1 }
  0xc7   :  { %660 = vmatprep.subr.mxu1 %v659_v26 }
  0xc8   :  { %v226_v27 = vpop.f32.mrf.mxu1  ;;  %661 = vmatpush3.msra.mxu1 %v659_v26 }
  0xc9   :  { %662 = vmatprep.subr.mxu1 %v226_v27 }
  0xca   :  { %663 = vmatpush3.msra.mxu1 %v226_v27 }
  0xcb   :  { %667 = vmatprep.subr.msk.mxu1 %vm330_vm7, %v144_v30 }
 0x164   :  { %v654_v28 = vpop.f32.mrf.mxu0 }
 0x166   :  { %v133_v29 = vpop.f32.mrf.mxu0 }
 0x167   :  { %664 = vmatprep.mubr.msk.f32.mxu1 %vm239_vm6, %v133_v29  ;;  %678 = vmatprep.mubr.msk.f32.mxu0 %vm239_vm6, %v133_v29 }
 0x168   :  { %665 = vmatmul.mubr.msk.f32.vlgmr.msra.gmra.mxu1 %vm239_vm6, %v654_v28 }
 0x169   :  { %668 = vmatpush3.msk.msra.mxu1 %vm330_vm7, %v144_v30 }
 0x16a   :  { %669 = vmatprep.subr.mxu1 %v143_v31 }
 0x16b   :  { %670 = vmatpush3.msra.mxu1 %v143_v31 }
 0x16c   :  { %681 = vmatprep.subr.msk.mxu1 %vm505_vm9, %v493_v39 }
 0x228   :  { %v666_v33 = vpop.f32.mrf.mxu1 }
 0x229   :  { %v318_v34 = vadd.f32 %v666_v33, %v613_v32 }
 0x22a   :  { %v312_v35 = vpop.f32.mrf.mxu1 }
 0x22b   :  { %v313_v36 = vadd.f32 %v613_v32, %v312_v35  ;;  %v322_v38 = vmax.f32 %v318_v34, 0.0 }
 0x22d   :  { %v321_v37 = vmax.f32 %v313_v36, 0.0 }
 0x22f   :  { %671 = vmatprep.mubr.msk.f32.mxu1 %vm323_vm8, %v321_v37 }
 0x230   :  { %672 = vmatmul.mubr.msk.f32.vlgmr.msra.gmra.mxu1 %vm323_vm8, %v322_v38 }
 0x231   :  { %682 = vmatpush3.msk.msra.mxu1 %vm505_vm9, %v493_v39  ;;  %685 = vmatprep.mubr.msk.f32.mxu1 %vm498_vm10, %v496_v41 }
 0x232   :  { %683 = vmatprep.subr.mxu1 %v492_v40 }
 0x233   :  { %684 = vmatpush3.msra.mxu1 %v492_v40 }
 0x234   :  { %686 = vmatmul.mubr.msk.f32.vlgmr.msra.gmra.mxu1 %vm498_vm10, %v497_v42 }
 0x2f0   :  { %v673_v43 = vpop.f32.mrf.mxu1 }
 0x2f1   :  { %674 = vmatprep.subr.mxu0 %v673_v43 }
 0x2f2   :  { %v400_v44 = vpop.f32.mrf.mxu1  ;;  %675 = vmatpush3.msra.mxu0 %v673_v43 }
 0x2f3   :  { %676 = vmatprep.subr.mxu0 %v400_v44 }
 0x2f4   :  { %677 = vmatpush3.msra.mxu0 %v400_v44  ;;  %v687_v45 = vpop.f32.mrf.mxu1 }
 0x2f5   :  { %679 = vmatmul.mubr.msk.f32.vlgmr.msra.gmra.mxu0 %vm239_vm6, %v654_v28  ;;  %v581_v49 = vadd.f32 %v687_v45, %v495_v46 }
 0x2f6   :  { %v575_v47 = vpop.f32.mrf.mxu1 }
 0x2f7   :  { %v576_v50 = vadd.f32 %v575_v47, %v494_v48  ;;  %585 = vst.msk [vmem:[%s837_s6 + $0x8] sm:$0xff] %vm149_vm2, %v581_v49 }
 0x2f9   :  { %584 = vst.msk [vmem:[%s837_s6] sm:$0xff] %vm149_vm2, %v576_v50 }
 0x3b5   :  { %v680_v52 = vpop.f32.mrf.mxu0 }
 0x3b6   :  { %v485_v53 = vadd.f32 %v680_v52, %v619_v51 }
 0x3b7   :  { %v479_v54 = vpop.f32.mrf.mxu0 }
 0x3b8   :  { %v489_v55 = vmax.f32 %v485_v53, 0.0  ;;  %v480_v56 = vadd.f32 %v619_v51, %v479_v54 }
 0x3ba   :  { %491 = vst.msk [vmem:[#allocation2 + $0x8] sm:$0xff] %vm323_vm8, %v489_v55  ;;  %v488_v57 = vmax.f32 %v480_v56, 0.0 }
 0x3bc   :  { %490 = vst.msk [vmem:[#allocation2] sm:$0xff] %vm323_vm8, %v488_v57 }
 0x3bd   :  { %708 = shalt.err (!%p705_p4)
}
 0x3be   :  { %s720_s2 = smov 128   ;;  %s721_s6 = smov 8  }
 0x3bf   :  { %597 = dma.vmem_to_hbm [thread:$0]  %s592_s4, 256, %s836_s5, [#allocation3], %s720_s2, %s720_s2, %s721_s6  }
 0x3c0   :  { %717 = dma.done.wait [#allocation3], 256  }
 0x3c1   :  { %718 = vsyncadd [#allocation3], 4294967040 }
 0x3c2   :  { %605 = vsyncpa [#allocation3], 1 }

</bundles_post_ra>
